<compile_context>
chip_gen: v7x
topology: tpu7x:2x2x1
jax: 0.10.0
libtpu: 0.0.40
codegen_flags: <defaults>
</compile_context>

<pallas_src>
import functools

import jax
import jax.numpy as jnp
from jax.experimental import pallas as pl
from jax.experimental.pallas import tpu as pltpu


def _attn_kernel(g_ref, x_ref, wg_ref, wx_ref, bgx_ref, wp_ref, bp_ref, o_ref):
    # g_ref: (F_g, TS), x_ref: (F_l, TS)   -- spatial on lanes, channels on sublanes
    # wg_ref: (F_int, F_g), wx_ref: (F_int, F_l), bgx_ref/wp_ref: (F_int, 1)
    # bp_ref: (1,) scalar in SMEM
    # Two small MXU pushes (hidden under DMA; the kernel is mem-bound).
    a = jnp.dot(wg_ref[...], g_ref[...], preferred_element_type=jnp.float32)
    a = a + jnp.dot(wx_ref[...], x_ref[...], preferred_element_type=jnp.float32)
    a = jnp.maximum(a + bgx_ref[...], 0.0)                            # (F_int, TS) ReLU
    # psi conv has a single output channel: VPU multiply + sublane reduce (XLU),
    # avoiding a width-1 MXU push.
    p = jnp.sum(a * wp_ref[...], axis=0, keepdims=True) + bp_ref[0]   # (1, TS)
    psi = jax.nn.sigmoid(p)
    o_ref[...] = (x_ref[...].astype(jnp.float32) * psi).astype(o_ref.dtype)


def _fold_bn(w, b, gamma, beta, rmean, rvar, eps=1e-5):
    """Fold conv bias + eval-mode BatchNorm into effective (w_eff, b_eff).

    w: (C_out, C_in) conv1x1x1 weight, b: (C_out,).
    Returns w_eff (C_out, C_in) for LEFT multiplication (W @ tile) and
    b_eff (C_out,).
    """
    scale = gamma / jnp.sqrt(rvar + eps)              # (C_out,)
    shift = beta - rmean * scale                      # (C_out,)
    w_eff = w * scale[:, None]                        # (C_out, C_in)
    b_eff = b * scale + shift                         # (C_out,)
    return w_eff.astype(jnp.float32), b_eff.astype(jnp.float32)


def _vmem_capacity_bytes():
    """Per-generation VMEM capacity; conservative fallback if the query fails."""
    try:
        return int(pltpu.get_tpu_info().vmem_capacity_bytes)
    except Exception:
        return 64 << 20          # v7x per-TC physical VMEM (smallest of the gens)


def _choose_tile(S, N, F_g, F_l, F_int, itemsize, vmem_budget_bytes):
    """Largest lane tile that fits the VMEM budget, keeping >=4 grid steps."""
    # Sublane padding: an (F, ts) tile of this dtype occupies ceil(F/sub)*sub rows
    # (f32 -> 8, bf16 -> 16, int8 -> 32 sublanes per vreg tile).
    sub_io = max(8, 32 // itemsize)
    pad_io = lambda c: -(-c // sub_io) * sub_io
    pad32 = lambda c: -(-c // 8) * 8

    per_lane = (
        2 * (pad_io(F_g) + 2 * pad_io(F_l)) * itemsize      # double-buffered g/x/out tiles
        + 2 * (pad32(F_int) + pad32(F_l) + 16) * 4          # f32 temporaries (a, x_f32, p/psi) + headroom
    )
    ts_vmem = max(128, (int(vmem_budget_bytes) // per_lane) // 128 * 128)

    # Keep >=4 total grid steps when the spatial extent permits: v7x has 2 TCs
    # sharded via "parallel" semantics, and the pipeline needs >1 step anyway.
    want_ns = max(1, -(-4 // N))
    if S > want_ns * 256:
        ts_par = max(128, (S // want_ns) // 128 * 128)
    else:
        ts_par = S

    ts = min(ts_vmem, ts_par)
    if ts >= S:
        return S                                  # full-extent block (no (8,128) constraint)
    return max(128, (ts // 128) * 128)


@functools.partial(jax.jit, static_argnames=("ts",))
def attention_block3d(g, x, params, ts=None):
    """g: (N, F_g, D, H, W), x: (N, F_l, D, H, W)  ->  (N, F_l, D, H, W)."""
    N, F_g, D, H, W = g.shape
    _, F_l, _, _, _ = x.shape
    S = D * H * W

    wg, bg = _fold_bn(params["wg"], params["bg"], params["bn_g_gamma"],
                      params["bn_g_beta"], params["bn_g_mean"], params["bn_g_var"])
    wx, bx = _fold_bn(params["wx"], params["bx"], params["bn_x_gamma"],
                      params["bn_x_beta"], params["bn_x_mean"], params["bn_x_var"])
    wp, bp = _fold_bn(params["wpsi"], params["bpsi"], params["bn_p_gamma"],
                      params["bn_p_beta"], params["bn_p_mean"], params["bn_p_var"])
    F_int = wg.shape[0]

    bgx = (bg + bx).reshape(F_int, 1)       # pre-add the two pre-ReLU biases
    wp_col = wp.reshape(F_int, 1)           # (1, F_int) -> (F_int, 1)
    bp = bp.reshape(1)                      # scalar, goes to SMEM

    # ---- Generation-aware tile selection -------------------------------------
    itemsize = jnp.dtype(x.dtype).itemsize
    capacity = _vmem_capacity_bytes()
    # Headroom for compiler scratch / spill / resident weights: ~44 MiB usable
    # for tiles on v7x (64 MiB), ~108 MiB on v5e/v6e (128 MiB).
    tile_budget = max(16 << 20, capacity - (20 << 20))
    ts_auto = _choose_tile(S, N, F_g, F_l, F_int, itemsize, tile_budget)
    if ts is not None:                       # optional user cap
        ts_auto = min(ts_auto, ts if ts >= S else max(128, (ts // 128) * 128))
    ts = min(ts_auto, S)
    n_s = pl.cdiv(S, ts)

    # Scoped VMEM limit: generous but below physical capacity on every gen.
    vmem_limit = int(min(capacity - (4 << 20), max(32 << 20, capacity - (8 << 20))))

    # Free reshapes only (no data movement): NCDHW -> (N, C, S).
    g3 = g.reshape(N, F_g, S)
    x3 = x.reshape(N, F_l, S)

    row = lambda n, s: (n, 0, s)
    full2 = lambda n, s: (0, 0)

    out3 = pl.pallas_call(
        _attn_kernel,
        out_shape=jax.ShapeDtypeStruct((N, F_l, S), x.dtype),
        grid=(N, n_s),
        in_specs=[
            pl.BlockSpec((None, F_g, ts), row),            # g tile (F_g, ts)
            pl.BlockSpec((None, F_l, ts), row),            # x tile (F_l, ts)
            pl.BlockSpec((F_int, F_g), full2),             # folded W_g (resident)
            pl.BlockSpec((F_int, F_l), full2),             # folded W_x (resident)
            pl.BlockSpec((F_int, 1), full2),               # folded b_g + b_x
            pl.BlockSpec((F_int, 1), full2),               # folded W_psi (column)
            pl.BlockSpec(memory_space=pltpu.MemorySpace.SMEM),   # folded b_psi scalar
        ],
        out_specs=pl.BlockSpec((None, F_l, ts), row),      # lane-dense output
        compiler_params=pltpu.CompilerParams(
            dimension_semantics=("parallel", "parallel"),
            vmem_limit_bytes=vmem_limit),
    )(g3, x3, wg, wx, bgx, wp_col, bp)

    return out3.reshape(N, F_l, D, H, W)


def make_params(key, F_g, F_l, F_int):
    ks = jax.random.split(key, 6)
    p = {
        "wg": jax.random.normal(ks[0], (F_int, F_g), jnp.float32) * 0.1,
        "bg": jax.random.normal(ks[1], (F_int,), jnp.float32) * 0.1,
        "wx": jax.random.normal(ks[2], (F_int, F_l), jnp.float32) * 0.1,
        "bx": jax.random.normal(ks[3], (F_int,), jnp.float32) * 0.1,
        "wpsi": jax.random.normal(ks[4], (1, F_int), jnp.float32) * 0.1,
        "bpsi": jax.random.normal(ks[5], (1,), jnp.float32) * 0.1,
        # BatchNorm3d default init (eval mode running stats)
        "bn_g_gamma": jnp.ones((F_int,), jnp.float32),
        "bn_g_beta": jnp.zeros((F_int,), jnp.float32),
        "bn_g_mean": jnp.zeros((F_int,), jnp.float32),
        "bn_g_var": jnp.ones((F_int,), jnp.float32),
        "bn_x_gamma": jnp.ones((F_int,), jnp.float32),
        "bn_x_beta": jnp.zeros((F_int,), jnp.float32),
        "bn_x_mean": jnp.zeros((F_int,), jnp.float32),
        "bn_x_var": jnp.ones((F_int,), jnp.float32),
        "bn_p_gamma": jnp.ones((1,), jnp.float32),
        "bn_p_beta": jnp.zeros((1,), jnp.float32),
        "bn_p_mean": jnp.zeros((1,), jnp.float32),
        "bn_p_var": jnp.ones((1,), jnp.float32),
    }
    return p


def _reference(g, x, params, eps=1e-5):
    """Pure-JAX reference mirroring the PyTorch forward (eval-mode BN)."""
    def conv_bn(inp, w, b, gamma, beta, rm, rv):
        y = jnp.einsum("ncdhw,oc->nodhw", inp, w) + b[None, :, None, None, None]
        scale = gamma / jnp.sqrt(rv + eps)
        shift = beta - rm * scale
        return y * scale[None, :, None, None, None] + shift[None, :, None, None, None]

    g1 = conv_bn(g, params["wg"], params["bg"], params["bn_g_gamma"],
                 params["bn_g_beta"], params["bn_g_mean"], params["bn_g_var"])
    x1 = conv_bn(x, params["wx"], params["bx"], params["bn_x_gamma"],
                 params["bn_x_beta"], params["bn_x_mean"], params["bn_x_var"])
    psi = jnp.maximum(g1 + x1, 0.0)
    psi = conv_bn(psi, params["wpsi"], params["bpsi"], params["bn_p_gamma"],
                  params["bn_p_beta"], params["bn_p_mean"], params["bn_p_var"])
    psi = jax.nn.sigmoid(psi)
    return x * psi


if __name__ == "__main__":
    key = jax.random.PRNGKey(0)
    k_g, k_x, k_p, k_g2, k_x2 = jax.random.split(key, 5)

    N, F_g, F_l, F_int = 2, 4, 4, 8
    D = H = W = 16                    # S = 4096

    g = jax.random.normal(k_g, (N, F_g, D, H, W), jnp.float32)
    x = jax.random.normal(k_x, (N, F_l, D, H, W), jnp.float32)
    params = make_params(k_p, F_g, F_l, F_int)

    out = attention_block3d(g, x, params)
    out = jax.block_until_ready(out)
    ref = _reference(g, x, params)
    assert out.shape == x.shape
    assert jnp.allclose(out, ref, atol=1e-5, rtol=1e-5), "mismatch vs reference"

    # Ragged spatial extent (S = 576, not a multiple of 128): exercises the
    # full-extent / masked-tail paths with the auto-sized tile.
    D2, H2, W2 = 8, 8, 9
    g2 = jax.random.normal(k_g2, (1, F_g, D2, H2, W2), jnp.float32)
    x2 = jax.random.normal(k_x2, (1, F_l, D2, H2, W2), jnp.float32)
    out2 = jax.block_until_ready(attention_block3d(g2, x2, params))
    ref2 = _reference(g2, x2, params)
    assert out2.shape == x2.shape
    assert jnp.allclose(out2, ref2, atol=1e-5, rtol=1e-5), "mismatch vs reference (tail)"

    # User-capped tile path (exercises the optional ts cap + masked tail block).
    out3 = jax.block_until_ready(attention_block3d(g, x, params, ts=512))
    assert jnp.allclose(out3, ref, atol=1e-5, rtol=1e-5), "mismatch vs reference (capped ts)"

    print("KERNEL_OK")
</pallas_src>

<mosaic_0001>
module attributes {stable_mosaic.version = 11 : i64} {
  func.func @_attn_kernel(%arg0: i32, %arg1: i32, %arg2: memref<1x4x2048xf32, #tpu.memory_space<vmem>>, %arg3: memref<1x4x2048xf32, #tpu.memory_space<vmem>>, %arg4: memref<8x4xf32, #tpu.memory_space<vmem>>, %arg5: memref<8x4xf32, #tpu.memory_space<vmem>>, %arg6: memref<8x1xf32, #tpu.memory_space<vmem>>, %arg7: memref<8x1xf32, #tpu.memory_space<vmem>>, %arg8: memref<1xf32, #tpu.memory_space<smem>>, %arg9: memref<1x4x2048xf32, #tpu.memory_space<vmem>>) attributes {dimension_semantics = [#tpu.dimension_semantics<parallel>, #tpu.dimension_semantics<parallel>], iteration_bounds = array<i64: 2, 2>, scalar_prefetch = 0 : i64, scratch_operands = 0 : i64, tpu.core_type = #tpu.core_type<tc>, window_params = [{transform_indices = @transform_0, window_bounds = array<i64: 1, 4, 2048>}, {transform_indices = @transform_1, window_bounds = array<i64: 1, 4, 2048>}, {pipeline_mode = #tpu.pipeline_mode<synchronous>, transform_indices = @transform_2, window_bounds = array<i64: 8, 4>}, {pipeline_mode = #tpu.pipeline_mode<synchronous>, transform_indices = @transform_3, window_bounds = array<i64: 8, 4>}, {pipeline_mode = #tpu.pipeline_mode<synchronous>, transform_indices = @transform_4, window_bounds = array<i64: 8, 1>}, {pipeline_mode = #tpu.pipeline_mode<synchronous>, transform_indices = @transform_5, window_bounds = array<i64: 8, 1>}, {transform_indices = @transform_6, window_bounds = array<i64: 1>}, {transform_indices = @transform_7, window_bounds = array<i64: 1, 4, 2048>}]} {
    %c0 = arith.constant 0 : index
    %c0_0 = arith.constant 0 : index
    %0 = vector.load %arg4[%c0, %c0_0] : memref<8x4xf32, #tpu.memory_space<vmem>>, vector<8x4xf32>
    %c0_1 = arith.constant 0 : index
    %c0_2 = arith.constant 0 : index
    %c0_3 = arith.constant 0 : index
    %1 = vector.load %arg2[%c0_1, %c0_2, %c0_3] : memref<1x4x2048xf32, #tpu.memory_space<vmem>>, vector<1x4x2048xf32>
    %2 = vector.shape_cast %1 : vector<1x4x2048xf32> to vector<4x2048xf32>
    %cst = arith.constant dense<0.000000e+00> : vector<8x2048xf32>
    %3 = tpu.matmul %0, %2, %cst {dimension_numbers = #tpu.dot_dimension_numbers<[1], [0], [0], [1], [0, 0, 1, 1], [], []>} : vector<8x4xf32>, vector<4x2048xf32>, vector<8x2048xf32> -> vector<8x2048xf32>
    %c0_4 = arith.constant 0 : index
    %c0_5 = arith.constant 0 : index
    %4 = vector.load %arg5[%c0_4, %c0_5] : memref<8x4xf32, #tpu.memory_space<vmem>>, vector<8x4xf32>
    %c0_6 = arith.constant 0 : index
    %c0_7 = arith.constant 0 : index
    %c0_8 = arith.constant 0 : index
    %5 = vector.load %arg3[%c0_6, %c0_7, %c0_8] : memref<1x4x2048xf32, #tpu.memory_space<vmem>>, vector<1x4x2048xf32>
    %6 = vector.shape_cast %5 : vector<1x4x2048xf32> to vector<4x2048xf32>
    %cst_9 = arith.constant dense<0.000000e+00> : vector<8x2048xf32>
    %7 = tpu.matmul %4, %6, %cst_9 {dimension_numbers = #tpu.dot_dimension_numbers<[1], [0], [0], [1], [0, 0, 1, 1], [], []>} : vector<8x4xf32>, vector<4x2048xf32>, vector<8x2048xf32> -> vector<8x2048xf32>
    %8 = arith.addf %3, %7 : vector<8x2048xf32>
    %c0_10 = arith.constant 0 : index
    %c0_11 = arith.constant 0 : index
    %9 = vector.load %arg6[%c0_10, %c0_11] : memref<8x1xf32, #tpu.memory_space<vmem>>, vector<8x1xf32>
    %10 = vector.broadcast %9 : vector<8x1xf32> to vector<8x2048xf32>
    %11 = arith.addf %8, %10 : vector<8x2048xf32>
    %cst_12 = arith.constant 0.000000e+00 : f32
    %12 = vector.broadcast %cst_12 : f32 to vector<8x2048xf32>
    %13 = arith.maximumf %11, %12 : vector<8x2048xf32>
    %c0_13 = arith.constant 0 : index
    %c0_14 = arith.constant 0 : index
    %14 = vector.load %arg7[%c0_13, %c0_14] : memref<8x1xf32, #tpu.memory_space<vmem>>, vector<8x1xf32>
    %15 = vector.broadcast %14 : vector<8x1xf32> to vector<8x2048xf32>
    %16 = arith.mulf %13, %15 : vector<8x2048xf32>
    %cst_15 = arith.constant dense<0.000000e+00> : vector<2048xf32>
    %17 = vector.multi_reduction <add>, %16, %cst_15 [0] : vector<8x2048xf32> to vector<2048xf32>
    %18 = vector.shape_cast %17 : vector<2048xf32> to vector<1x2048xf32>
    %c0_16 = arith.constant 0 : index
    %19 = memref.load %arg8[%c0_16] : memref<1xf32, #tpu.memory_space<smem>>
    %20 = vector.broadcast %19 : f32 to vector<1x2048xf32>
    %21 = arith.addf %18, %20 : vector<1x2048xf32>
    %22 = arith.negf %21 : vector<1x2048xf32>
    %23 = math.exp %22 : vector<1x2048xf32>
    %cst_17 = arith.constant 1.000000e+00 : f32
    %24 = vector.broadcast %cst_17 : f32 to vector<1x2048xf32>
    %25 = arith.addf %24, %23 : vector<1x2048xf32>
    %26 = arith.divf %24, %25 : vector<1x2048xf32>
    %c0_18 = arith.constant 0 : index
    %c0_19 = arith.constant 0 : index
    %c0_20 = arith.constant 0 : index
    %27 = vector.load %arg3[%c0_18, %c0_19, %c0_20] : memref<1x4x2048xf32, #tpu.memory_space<vmem>>, vector<1x4x2048xf32>
    %28 = vector.shape_cast %27 : vector<1x4x2048xf32> to vector<4x2048xf32>
    %29 = vector.broadcast %26 : vector<1x2048xf32> to vector<4x2048xf32>
    %30 = arith.mulf %28, %29 : vector<4x2048xf32>
    %c0_21 = arith.constant 0 : index
    %c0_22 = arith.constant 0 : index
    %c0_23 = arith.constant 0 : index
    %31 = vector.load %arg9[%c0_21, %c0_22, %c0_23] : memref<1x4x2048xf32, #tpu.memory_space<vmem>>, vector<1x4x2048xf32>
    %32 = vector.shape_cast %31 : vector<1x4x2048xf32> to vector<4x2048xf32>
    %33 = vector.shape_cast %30 : vector<4x2048xf32> to vector<1x4x2048xf32>
    tpu.vector_store %arg9[%c0_21, %c0_22, %c0_23], %33 {strides = array<i32>} : memref<1x4x2048xf32, #tpu.memory_space<vmem>>, vector<1x4x2048xf32>,
    return
  }
  func.func @transform_0(%arg0: i32, %arg1: i32) -> (i32, i32, i32) {
    %c0_i32 = arith.constant 0 : i32
    %c0_i32_0 = arith.constant 0 : i32
    return %arg0, %c0_i32, %arg1 : i32, i32, i32
  }
  func.func @transform_1(%arg0: i32, %arg1: i32) -> (i32, i32, i32) {
    %c0_i32 = arith.constant 0 : i32
    %c0_i32_0 = arith.constant 0 : i32
    return %arg0, %c0_i32, %arg1 : i32, i32, i32
  }
  func.func @transform_2(%arg0: i32, %arg1: i32) -> (i32, i32) {
    %c0_i32 = arith.constant 0 : i32
    %c0_i32_0 = arith.constant 0 : i32
    %c0_i32_1 = arith.constant 0 : i32
    return %c0_i32, %c0_i32_0 : i32, i32
  }
  func.func @transform_3(%arg0: i32, %arg1: i32) -> (i32, i32) {
    %c0_i32 = arith.constant 0 : i32
    %c0_i32_0 = arith.constant 0 : i32
    %c0_i32_1 = arith.constant 0 : i32
    return %c0_i32, %c0_i32_0 : i32, i32
  }
  func.func @transform_4(%arg0: i32, %arg1: i32) -> (i32, i32) {
    %c0_i32 = arith.constant 0 : i32
    %c0_i32_0 = arith.constant 0 : i32
    %c0_i32_1 = arith.constant 0 : i32
    return %c0_i32, %c0_i32_0 : i32, i32
  }
  func.func @transform_5(%arg0: i32, %arg1: i32) -> (i32, i32) {
    %c0_i32 = arith.constant 0 : i32
    %c0_i32_0 = arith.constant 0 : i32
    %c0_i32_1 = arith.constant 0 : i32
    return %c0_i32, %c0_i32_0 : i32, i32
  }
  func.func @transform_6(%arg0: i32, %arg1: i32) -> i32 {
    %c0_i32 = arith.constant 0 : i32
    %c0_i32_0 = arith.constant 0 : i32
    return %c0_i32 : i32
  }
  func.func @transform_7(%arg0: i32, %arg1: i32) -> (i32, i32, i32) {
    %c0_i32 = arith.constant 0 : i32
    %c0_i32_0 = arith.constant 0 : i32
    return %arg0, %c0_i32, %arg1 : i32, i32, i32
  }
}

</mosaic_0001>

<bundles_post_ra>
// kernel: attention_block3d.1
= control target key start
LH: loop header
LB: loop body
LE: loop exit
PB: predicated region body
PF: predicated region fallthrough
CT: control target
= control target key end

     0   :  { %s2343_s26 = smov 0   ;;  %s2345_s27 = smov 0   ;;  %s2627_s0 = inlined_call_operand.vmem [shape: f32[2,4,4096], index: 0, kind: input, shape index: {}]   ;;  %s2628_s1 = inlined_call_operand.vmem [shape: f32[2,4,4096], index: 1, kind: input, shape index: {}]   ;;  %s2629_s2 = inlined_call_operand.vmem [shape: f32[8,4], index: 2, kind: input, shape index: {}]   ;;  %s2630_s3 = inlined_call_operand.vmem [shape: f32[8,4], index: 3, kind: input, shape index: {}]   ;;  %s2631_s4 = inlined_call_operand.vmem [shape: f32[8,1], index: 4, kind: input, shape index: {}]   ;;  %s2632_s5 = inlined_call_operand.vmem [shape: f32[8,1], index: 5, kind: input, shape index: {}]   ;;  %s2633_s6 = inlined_call_operand.<no memory space> [shape: f32[1], index: 6, kind: input, shape index: {}]   ;;  %s2634_s7 = inlined_call_operand.vmem [shape: f32[2,4,4096], index: 7, kind: output, shape index: {}]  }
   0x1   :  { %12 = sst [smem:[#allocation2]] %s2633_s6  ;;  %s2347_s28 = smov 0  }
   0x2   :  { %s2349_s29 = smov 0   ;;  %s2351_s30 = smov 0  }
   0x3 LB: > { %s27_s6 = sadd.s32 1, %s2288_s28  ;;  %s30_s8 = sadd.s32 1, %s2292_s29  ;;  %s2296_s30 = sphi %s2351_s30, %s18_s30   ;;  %s2292_s29 = sphi %s2349_s29, %s2638_s29   ;;  %s2288_s28 = sphi %s2347_s28, %s2637_s28   ;;  %s2284_s27 = sphi %s2345_s27, %s2636_s27   ;;  %s2280_s26 = sphi %s2343_s26, %s2635_s26  }
   0x4   : > { %p28_p0 = scmp.ge.s32.totalorder %s27_s6, 2  ;;  %p2043_p1 = scmp.ge.s32.totalorder %s2296_s30, 1 }
   0x5   : > { %p276_p2 = scmp.lt.s32.totalorder %s2296_s30, 5 }
   0x6   : > { %s2640_s6 = smov (%p28_p0, %s27_s6), 0  ;;  %s2642_s8 = smov (!%p28_p0, %s30_s8), %s2292_s29 }
   0x7   : > { %p277_p3 = pnand %p2043_p1, %p276_p2  ;;  %p32_p4 = scmp.ge.s32.totalorder %s2642_s8, 2 }
   0x8   : > { %s2044_s9 = sshll.u32 (!%p277_p3), %s2280_s26, 4  ;;  %p326_p5 = scmp.lt.s32.totalorder (!%p277_p3), %s2284_s27, 1  ;;  %v2298_v0 = vmov (!%p277_p3), 0.0   ;;  %v1613_v1 = vld [vmem:[%s2631_s4] sm:$0xff] (!%p277_p3)  ;;  %v2299_v2 = vmov (!%p277_p3), 0   ;;  %vm393_vm0 = vcmask (!%p277_p3), 1043456  }
   0x9   : > { %s2644_s8 = smov (%p32_p4, %s2642_s8), 0  ;;  %280 = sbr.rel (%p277_p3) target bundleno = 347 (0x15b), region = 48 }
   0xa   : > { %p328_p6 = scmp.lt.s32.totalorder (!%p277_p3), %s2044_s9, 31  ;;  %490 = vmatprep.mubr.f32.mxu0 (!%p277_p3), %v2298_v0  ;;  %561 = vmatprep.mubr.f32.mxu1 (!%p277_p3), %v2298_v0  ;;  %v1651_v3 = vld [vmem:[%s2632_s5] sm:$0xff] (!%p277_p3)  ;;  %vm389_vm1 = vcmask (!%p277_p3), 31744  }
   0xb   : > { %2177 = vset.pattern.permute.xlu0 (!%p277_p3), %v2299_v2  ;;  %v364_v10 = vld [vmem:[%s2630_s3] sm:$0xff] (!%p277_p3) }
   0xc   : > { %1616 = vperm.xlu0 (!%p277_p3), %2177, %v1613_v1   ;;  %v355_v27 = vld [vmem:[%s2629_s2] sm:$0xff] (!%p277_p3) }
  0x10   : > { %s2646_s27 = smov (!%p326_p5, %s2284_s27), 1  ;;  %s2648_s9 = smov (!%p328_p6, %s2044_s9), 31  ;;  %1654 = vperm.xlu0 %2177, %v1651_v3  }
  0x11   : > { %s2045_s12 = sshll.u32 %s2646_s27, 5  ;;  %s1769_s27 = sld [smem:[#allocation2]] }
  0x12   : > { %s331_s15 = sadd.s32 %s2045_s12, %s2648_s9 }
  0x13   : > { %s2381_s16 = sshll.u32 %s331_s15, 2 }
  0x14   : > { %s343_s19 = scalar_lea.vmem %s2628_s1, %s2381_s16  ;;  %s2436_s24 = scalar_lea.vmem %s2627_s0, %s2381_s16 }
  0x15   : > { %v2387_v4 = vld [vmem:[%s343_s19] sm:$0xff]  ;;  %v2389_v5 = vld [vmem:[%s343_s19 + $0x8] sm:$0xff]  ;;  %v2391_v6 = vld [vmem:[%s343_s19 + $0x10] sm:$0xff]  ;;  %s2590_s11 = scalar_lea.vmem %s2634_s7, %s2381_s16 }
  0x16   : > { %v381_v7 = vcombine.high %v2387_v4, %v2387_v4  ;;  %v382_v8 = vcombine.high %v2389_v5, %v2389_v5  ;;  %v2397_v9 = vld [vmem:[%s343_s19 + $0x18] sm:$0xff]  ;;  %v383_v11 = vcombine.high %v2391_v6, %v2391_v6  ;;  %v2408_v13 = vld [vmem:[%s343_s19 + $0x20] sm:$0xff]  ;;  %v2410_v14 = vld [vmem:[%s343_s19 + $0x28] sm:$0xff] }
  0x17   : > { %v384_v12 = vcombine.high %v2397_v9, %v2397_v9  ;;  %v385_v15 = vcombine.high %v2408_v13, %v2408_v13  ;;  %v386_v16 = vcombine.high %v2410_v14, %v2410_v14  ;;  %v2428_v17 = vld [vmem:[%s343_s19 + $0x30] sm:$0xff]  ;;  %v2430_v18 = vld [vmem:[%s343_s19 + $0x38] sm:$0xff]  ;;  %v356_v21 = vld [vmem:[%s2436_s24] sm:$0xff]  ;;  %v2517_v52 = vstv %s1769_s27 }
  0x18   : > { %2053 = vmatprep.subr.msk.mxu0 %vm393_vm0, %v381_v7  ;;  %2056 = vmatprep.subr.msk.mxu1 %vm393_vm0, %v382_v8  ;;  %v387_v19 = vcombine.high %v2428_v17, %v2428_v17  ;;  %v388_v20 = vcombine.high %v2430_v18, %v2430_v18  ;;  %v357_v22 = vld [vmem:[%s2436_s24 + $0x8] sm:$0xff]  ;;  %v1002_v23 = vcombine.high %v356_v21, %v356_v21  ;;  %v358_v25 = vld [vmem:[%s2436_s24 + $0x10] sm:$0xff]  ;;  %v359_v26 = vld [vmem:[%s2436_s24 + $0x18] sm:$0xff] }
  0x19   : > { %2054 = vmatpush1.msk.msra.mxu0 %vm393_vm0, %v2387_v4  ;;  %2057 = vmatpush1.msk.msra.mxu1 %vm393_vm0, %v2389_v5  ;;  %v1003_v24 = vcombine.high %v357_v22, %v357_v22  ;;  %v1004_v28 = vcombine.high %v358_v25, %v358_v25  ;;  %v1005_v29 = vcombine.high %v359_v26, %v359_v26  ;;  %v360_v30 = vld [vmem:[%s2436_s24 + $0x20] sm:$0xff]  ;;  %v361_v31 = vld [vmem:[%s2436_s24 + $0x28] sm:$0xff]  ;;  %v362_v34 = vld [vmem:[%s2436_s24 + $0x30] sm:$0xff] }
  0x1a   : > { %2055 = vmatmul.mubr.msk.f32.vlgmr.msra.gmra.mrb[0].mxu0 %vm389_vm1, %v364_v10  ;;  %2058 = vmatmul.mubr.msk.f32.vlgmr.msra.gmra.mrb[0].mxu1 %vm389_vm1, %v364_v10  ;;  %v1006_v32 = vcombine.high %v360_v30, %v360_v30  ;;  %v1007_v33 = vcombine.high %v361_v31, %v361_v31  ;;  %v363_v35 = vld [vmem:[%s2436_s24 + $0x38] sm:$0xff]  ;;  %v1008_v36 = vcombine.high %v362_v34, %v362_v34 }
  0x1b   : > { %2059 = vmatprep.subr.msk.mxu0 %vm393_vm0, %v383_v11  ;;  %2062 = vmatprep.subr.msk.mxu1 %vm393_vm0, %v384_v12  ;;  %v1009_v37 = vcombine.high %v363_v35, %v363_v35 }
  0x1c   : > { %2060 = vmatpush1.msk.msra.mxu0 %vm393_vm0, %v2391_v6  ;;  %2063 = vmatpush1.msk.msra.mxu1 %vm393_vm0, %v2397_v9 }
  0x1d   : > { %632 = vmatprep.mubr.f32.mxu0 %v2298_v0  ;;  %703 = vmatprep.mubr.f32.mxu1 %v2298_v0 }
  0x1e   : > { %2061 = vmatmul.mubr.msk.f32.vlgmr.msra.gmra.mrb[2].mxu0 %vm389_vm1, %v364_v10  ;;  %2064 = vmatmul.mubr.msk.f32.vlgmr.msra.gmra.mrb[2].mxu1 %vm389_vm1, %v364_v10 }
  0x1f   : > { %2065 = vmatprep.subr.msk.mxu0 %vm393_vm0, %v385_v15  ;;  %2068 = vmatprep.subr.msk.mxu1 %vm393_vm0, %v386_v16 }
  0x20   : > { %2066 = vmatpush1.msk.msra.mxu0 %vm393_vm0, %v2408_v13  ;;  %2069 = vmatpush1.msk.msra.mxu1 %vm393_vm0, %v2410_v14 }
  0x21   : > { %774 = vmatprep.mubr.f32.mxu0 %v2298_v0  ;;  %845 = vmatprep.mubr.f32.mxu1 %v2298_v0 }
  0x22   : > { %2067 = vmatmul.mubr.msk.f32.vlgmr.msra.gmra.mrb[4].mxu0 %vm389_vm1, %v364_v10  ;;  %2070 = vmatmul.mubr.msk.f32.vlgmr.msra.gmra.mrb[4].mxu1 %vm389_vm1, %v364_v10 }
  0x23   : > { %2071 = vmatprep.subr.msk.mxu0 %vm393_vm0, %v387_v19  ;;  %2074 = vmatprep.subr.msk.mxu1 %vm393_vm0, %v388_v20 }
  0x24   : > { %2072 = vmatpush1.msk.msra.mxu0 %vm393_vm0, %v2428_v17  ;;  %2075 = vmatpush1.msk.msra.mxu1 %vm393_vm0, %v2430_v18 }
  0x25   : > { %916 = vmatprep.mubr.f32.mxu0 %v2298_v0  ;;  %987 = vmatprep.mubr.f32.mxu1 %v2298_v0 }
  0x26   : > { %2073 = vmatmul.mubr.msk.f32.vlgmr.msra.gmra.mrb[6].mxu0 %vm389_vm1, %v364_v10  ;;  %2076 = vmatmul.mubr.msk.f32.vlgmr.msra.gmra.mrb[6].mxu1 %vm389_vm1, %v364_v10 }
  0x27   : > { %2077 = vmatprep.subr.msk.mxu0 %vm393_vm0, %v1002_v23  ;;  %2080 = vmatprep.subr.msk.mxu1 %vm393_vm0, %v1003_v24 }
  0x28   : > { %2078 = vmatpush1.msk.msra.mxu0 %vm393_vm0, %v356_v21  ;;  %2081 = vmatpush1.msk.msra.mxu1 %vm393_vm0, %v357_v22 }
  0x29   : > { %1109 = vmatprep.mubr.f32.mxu0 %v2298_v0  ;;  %1180 = vmatprep.mubr.f32.mxu1 %v2298_v0 }
  0x2a   : > { %2079 = vmatmul.mubr.msk.f32.vlgmr.msra.gmra.mrb[0].mxu0 %vm389_vm1, %v355_v27  ;;  %2082 = vmatmul.mubr.msk.f32.vlgmr.msra.gmra.mrb[0].mxu1 %vm389_vm1, %v355_v27 }
  0x2b   : > { %2083 = vmatprep.subr.msk.mxu0 %vm393_vm0, %v1004_v28  ;;  %2086 = vmatprep.subr.msk.mxu1 %vm393_vm0, %v1005_v29 }
  0x2c   : > { %2084 = vmatpush1.msk.msra.mxu0 %vm393_vm0, %v358_v25  ;;  %2087 = vmatpush1.msk.msra.mxu1 %vm393_vm0, %v359_v26 }
  0x2d   : > { %1251 = vmatprep.mubr.f32.mxu0 %v2298_v0  ;;  %1322 = vmatprep.mubr.f32.mxu1 %v2298_v0 }
  0x2e   : > { %2085 = vmatmul.mubr.msk.f32.vlgmr.msra.gmra.mrb[2].mxu0 %vm389_vm1, %v355_v27  ;;  %2088 = vmatmul.mubr.msk.f32.vlgmr.msra.gmra.mrb[2].mxu1 %vm389_vm1, %v355_v27 }
  0x2f   : > { %2089 = vmatprep.subr.msk.mxu0 %vm393_vm0, %v1006_v32  ;;  %2092 = vmatprep.subr.msk.mxu1 %vm393_vm0, %v1007_v33 }
  0x30   : > { %2090 = vmatpush1.msk.msra.mxu0 %vm393_vm0, %v360_v30  ;;  %2093 = vmatpush1.msk.msra.mxu1 %vm393_vm0, %v361_v31 }
  0x31   : > { %1393 = vmatprep.mubr.f32.mxu0 %v2298_v0  ;;  %1464 = vmatprep.mubr.f32.mxu1 %v2298_v0 }
  0x32   : > { %2091 = vmatmul.mubr.msk.f32.vlgmr.msra.gmra.mrb[4].mxu0 %vm389_vm1, %v355_v27  ;;  %2094 = vmatmul.mubr.msk.f32.vlgmr.msra.gmra.mrb[4].mxu1 %vm389_vm1, %v355_v27 }
  0x33   : > { %2095 = vmatprep.subr.msk.mxu0 %vm393_vm0, %v1008_v36  ;;  %2098 = vmatprep.subr.msk.mxu1 %vm393_vm0, %v1009_v37 }
  0x34   : > { %2096 = vmatpush1.msk.msra.mxu0 %vm393_vm0, %v362_v34  ;;  %2099 = vmatpush1.msk.msra.mxu1 %vm393_vm0, %v363_v35 }
  0x35   : > { %1535 = vmatprep.mubr.f32.mxu0 %v2298_v0  ;;  %1606 = vmatprep.mubr.f32.mxu1 %v2298_v0 }
  0x36   : > { %2097 = vmatmul.mubr.msk.f32.vlgmr.msra.gmra.mrb[6].mxu0 %vm389_vm1, %v355_v27  ;;  %2100 = vmatmul.mubr.msk.f32.vlgmr.msra.gmra.mrb[6].mxu1 %vm389_vm1, %v355_v27 }
  0x8b   : > { %v2509_v38 = vpop.permute.xlu0 %1616 }
  0x8f   : > { %v2515_v47 = vpop.permute.xlu0 %1654 }
  0xfd   : > { %v1111_v39 = vpop.f32.mrb[0].mxu0  ;;  %v1182_v40 = vpop.f32.mrb[0].mxu1 }
  0xfe   : > { %v1619_v41 = vadd.f32 %v2509_v38, %v1111_v39  ;;  %v1621_v42 = vadd.f32 %v2509_v38, %v1182_v40  ;;  %v1113_v43 = vpop.f32.mrb[1].mxu0  ;;  %v1184_v44 = vpop.f32.mrb[1].mxu1 }
  0xff   : > { %v1620_v45 = vadd.f32 %v2509_v38, %v1113_v43  ;;  %v1622_v46 = vadd.f32 %v2509_v38, %v1184_v44 }
 0x100   : > { %v1635_v48 = vmax.f32 %v1619_v41, 0.0  ;;  %v1637_v49 = vmax.f32 %v1621_v42, 0.0 }
 0x101   : > { %v1636_v50 = vmax.f32 %v1620_v45, 0.0  ;;  %v1638_v51 = vmax.f32 %v1622_v46, 0.0  ;;  %v1253_v53 = vpop.f32.mrb[2].mxu0  ;;  %v1324_v54 = vpop.f32.mrb[2].mxu1 }
 0x102   : > { %v1657_v55 = vmul.f32 %v2515_v47, %v1635_v48  ;;  %v1659_v56 = vmul.f32 %v2515_v47, %v1637_v49  ;;  %v1623_v57 = vadd.f32 %v2509_v38, %v1253_v53  ;;  %v1625_v58 = vadd.f32 %v2509_v38, %v1324_v54  ;;  %v1255_v59 = vpop.f32.mrb[3].mxu0  ;;  %v1326_v60 = vpop.f32.mrb[3].mxu1 }
 0x103   : > { %v1658_v61 = vmul.f32 %v2515_v47, %v1636_v50  ;;  %v1660_v62 = vmul.f32 %v2515_v47, %v1638_v51  ;;  %v1624_v63 = vadd.f32 %v2509_v38, %v1255_v59  ;;  %v1626_v0 = vadd.f32 %v2509_v38, %v1326_v60 }
 0x104   : > { %v1673_v1 = vrot.slane %v1657_v55, 4  ;;  %v1685_v2 = vrot.slane %v1659_v56, 4  ;;  %v1639_v3 = vmax.f32 %v1623_v57, 0.0  ;;  %v1641_v7 = vmax.f32 %v1625_v58, 0.0 }
 0x105   : > { %v1679_v8 = vrot.slane %v1658_v61, 4  ;;  %v1691_v10 = vrot.slane %v1660_v62, 4  ;;  %v1640_v11 = vmax.f32 %v1624_v63, 0.0  ;;  %v1642_v12 = vmax.f32 %v1626_v0, 0.0  ;;  %v2527_v15 = vpop.f32.mrb[4].mxu0  ;;  %v2529_v16 = vpop.f32.mrb[4].mxu1 }
 0x106   : > { %v1674_v19 = vadd.f32 %v1673_v1, %v1657_v55  ;;  %v1686_v20 = vadd.f32 %v1685_v2, %v1659_v56  ;;  %v1661_v21 = vmul.f32 %v2515_v47, %v1639_v3  ;;  %v1663_v22 = vmul.f32 %v2515_v47, %v1641_v7  ;;  %v2533_v23 = vpop.f32.mrb[5].mxu0  ;;  %v2535_v24 = vpop.f32.mrb[5].mxu1 }
 0x107   : > { %v1680_v25 = vadd.f32 %v1679_v8, %v1658_v61  ;;  %v1692_v26 = vadd.f32 %v1691_v10, %v1660_v62  ;;  %v1662_v27 = vmul.f32 %v2515_v47, %v1640_v11  ;;  %v1664_v28 = vmul.f32 %v2515_v47, %v1642_v12 }
 0x108   : > { %v1675_v29 = vrot.slane %v1674_v19, 2  ;;  %v1687_v30 = vrot.slane %v1686_v20, 2  ;;  %v1697_v31 = vrot.slane %v1661_v21, 4  ;;  %v1709_v32 = vrot.slane %v1663_v22, 4 }
 0x109   : > { %v1681_v33 = vrot.slane %v1680_v25, 2  ;;  %v1693_v34 = vrot.slane %v1692_v26, 2  ;;  %v1703_v35 = vrot.slane %v1662_v27, 4  ;;  %v1715_v36 = vrot.slane %v1664_v28, 4  ;;  %v2539_v37 = vpop.f32.mrb[6].mxu0  ;;  %v2541_v39 = vpop.f32.mrb[6].mxu1 }
 0x10a   : > { %v1676_v40 = vadd.f32 %v1675_v29, %v1674_v19  ;;  %v1688_v41 = vadd.f32 %v1687_v30, %v1686_v20  ;;  %v1698_v42 = vadd.f32 %v1697_v31, %v1661_v21  ;;  %v1710_v43 = vadd.f32 %v1709_v32, %v1663_v22  ;;  %v2543_v44 = vpop.f32.mrb[7].mxu0  ;;  %v2545_v45 = vpop.f32.mrb[7].mxu1 }
 0x10b   : > { %v1682_v46 = vadd.f32 %v1681_v33, %v1680_v25  ;;  %v1694_v48 = vadd.f32 %v1693_v34, %v1692_v26  ;;  %v1704_v49 = vadd.f32 %v1703_v35, %v1662_v27  ;;  %v1716_v50 = vadd.f32 %v1715_v36, %v1664_v28 }
 0x10c   : > { %v1677_v51 = vrot.slane %v1676_v40, 1  ;;  %v1689_v53 = vrot.slane %v1688_v41, 1  ;;  %v1699_v54 = vrot.slane %v1698_v42, 2  ;;  %v1711_v55 = vrot.slane %v1710_v43, 2 }
 0x10d   : > { %v1683_v56 = vrot.slane %v1682_v46, 1  ;;  %v1695_v57 = vrot.slane %v1694_v48, 1  ;;  %v1705_v58 = vrot.slane %v1704_v49, 2  ;;  %v1717_v59 = vrot.slane %v1716_v50, 2 }
 0x10e   : > { %v1678_v60 = vadd.f32 %v1677_v51, %v1676_v40  ;;  %v1690_v61 = vadd.f32 %v1689_v53, %v1688_v41  ;;  %v1700_v62 = vadd.f32 %v1699_v54, %v1698_v42  ;;  %v1712_v63 = vadd.f32 %v1711_v55, %v1710_v43 }
 0x10f   : > { %v1684_v0 = vadd.f32 %v1683_v56, %v1682_v46  ;;  %v1696_v1 = vadd.f32 %v1695_v57, %v1694_v48  ;;  %v1706_v2 = vadd.f32 %v1705_v58, %v1704_v49  ;;  %v1718_v3 = vadd.f32 %v1717_v59, %v1716_v50 }
 0x110   : > { %v1771_v7 = vadd.f32 %v2517_v52, %v1678_v60  ;;  %v1773_v8 = vadd.f32 %v2517_v52, %v1690_v61  ;;  %v1701_v10 = vrot.slane %v1700_v62, 1  ;;  %v1713_v11 = vrot.slane %v1712_v63, 1 }
 0x111   : > { %v1772_v12 = vadd.f32 %v2517_v52, %v1684_v0  ;;  %v1774_v19 = vadd.f32 %v2517_v52, %v1696_v1  ;;  %v1707_v20 = vrot.slane %v1706_v2, 1  ;;  %v1719_v21 = vrot.slane %v1718_v3, 1 }
 0x112   : > { %v2101_v22 = vmul.f32 -1.442695, %v1771_v7  ;;  %v2103_v25 = vmul.f32 -1.442695, %v1773_v8  ;;  %v1702_v26 = vadd.f32 %v1701_v10, %v1700_v62  ;;  %v1714_v27 = vadd.f32 %v1713_v11, %v1712_v63 }
 0x113   : > { %v2102_v28 = vmul.f32 -1.442695, %v1772_v12  ;;  %v2104_v29 = vmul.f32 -1.442695, %v1774_v19  ;;  %v1708_v30 = vadd.f32 %v1707_v20, %v1706_v2  ;;  %v1720_v31 = vadd.f32 %v1719_v21, %v1718_v3 }
 0x114   : > { %2194 = vpow2.f32 %v2101_v22  ;;  %v1775_v32 = vadd.f32 %v2517_v52, %v1702_v26  ;;  %v1777_v33 = vadd.f32 %v2517_v52, %v1714_v27  ;;  %v1627_v34 = vadd.f32 %v2509_v38, %v2527_v15 }
 0x115   : > { %2196 = vpow2.f32 %v2102_v28  ;;  %v1776_v35 = vadd.f32 %v2517_v52, %v1708_v30  ;;  %v1778_v36 = vadd.f32 %v2517_v52, %v1720_v31  ;;  %v1629_v40 = vadd.f32 %v2509_v38, %v2529_v16 }
 0x116   : > { %2198 = vpow2.f32 %v2103_v25  ;;  %v2105_v41 = vmul.f32 -1.442695, %v1775_v32  ;;  %v2107_v42 = vmul.f32 -1.442695, %v1777_v33  ;;  %v1643_v43 = vmax.f32 %v1627_v34, 0.0 }
 0x117   : > { %2200 = vpow2.f32 %v2104_v29  ;;  %v2106_v46 = vmul.f32 -1.442695, %v1776_v35  ;;  %v2108_v48 = vmul.f32 -1.442695, %v1778_v36  ;;  %v1645_v49 = vmax.f32 %v1629_v40, 0.0 }
 0x118   : > { %2202 = vpow2.f32 %v2105_v41  ;;  %v1665_v50 = vmul.f32 %v2515_v47, %v1643_v43  ;;  %v1628_v15 = vadd.f32 %v2509_v38, %v2533_v23  ;;  %v1630_v51 = vadd.f32 %v2509_v38, %v2535_v24 }
 0x119   : > { %2204 = vpow2.f32 %v2107_v42  ;;  %v1667_v16 = vmul.f32 %v2515_v47, %v1645_v49  ;;  %v1631_v53 = vadd.f32 %v2509_v38, %v2539_v37  ;;  %v1633_v54 = vadd.f32 %v2509_v38, %v2541_v39 }
 0x11a   : > { %2206 = vpow2.f32 %v2106_v46  ;;  %v1721_v55 = vrot.slane %v1665_v50, 4  ;;  %v1644_v56 = vmax.f32 %v1628_v15, 0.0  ;;  %v1646_v57 = vmax.f32 %v1630_v51, 0.0 }
 0x11b   : > { %2208 = vpow2.f32 %v2108_v48  ;;  %v1733_v58 = vrot.slane %v1667_v16, 4  ;;  %v1647_v59 = vmax.f32 %v1631_v53, 0.0  ;;  %v1649_v23 = vmax.f32 %v1633_v54, 0.0 }
 0x11c   : > { %v1722_v60 = vadd.f32 %v1721_v55, %v1665_v50  ;;  %v1666_v24 = vmul.f32 %v2515_v47, %v1644_v56  ;;  %v1668_v61 = vmul.f32 %v2515_v47, %v1646_v57  ;;  %v1632_v62 = vadd.f32 %v2509_v38, %v2543_v44 }
 0x11d   : > { %v1734_v37 = vadd.f32 %v1733_v58, %v1667_v16  ;;  %v1669_v63 = vmul.f32 %v2515_v47, %v1647_v59  ;;  %v1671_v39 = vmul.f32 %v2515_v47, %v1649_v23  ;;  %v2577_v0 = vadd.f32 %v2509_v38, %v2545_v45 }
 0x11e   : > { %v2195_v1 = vpop.eup %2194  ;;  %v1723_v2 = vrot.slane %v1722_v60, 2  ;;  %v1727_v3 = vrot.slane %v1666_v24, 4  ;;  %v1739_v7 = vrot.slane %v1668_v61, 4  ;;  %v1648_v8 = vmax.f32 %v1632_v62, 0.0 }
 0x11f   : > { %v2197_v10 = vpop.eup %2196  ;;  %v1835_v11 = vadd.f32 1.0, %v2195_v1  ;;  %v1735_v12 = vrot.slane %v1734_v37, 2  ;;  %v1745_v19 = vrot.slane %v1669_v63, 4  ;;  %v1757_v20 = vrot.slane %v1671_v39, 4 }
 0x120   : > { %v2199_v44 = vpop.eup %2198  ;;  %v1836_v21 = vadd.f32 1.0, %v2197_v10  ;;  %v1724_v22 = vadd.f32 %v1723_v2, %v1722_v60  ;;  %v1728_v25 = vadd.f32 %v1727_v3, %v1666_v24  ;;  %v1740_v26 = vadd.f32 %v1739_v7, %v1668_v61 }
 0x121   : > { %v2201_v27 = vpop.eup %2200  ;;  %v1837_v28 = vadd.f32 1.0, %v2199_v44  ;;  %2210 = vrcp.f32 %v1835_v11  ;;  %v1736_v38 = vadd.f32 %v1735_v12, %v1734_v37  ;;  %v1746_v45 = vadd.f32 %v1745_v19, %v1669_v63 }
 0x122   : > { %v2203_v29 = vpop.eup %2202  ;;  %v1838_v30 = vadd.f32 1.0, %v2201_v27  ;;  %2212 = vrcp.f32 %v1836_v21  ;;  %v1725_v31 = vrot.slane %v1724_v22, 1  ;;  %v1729_v32 = vrot.slane %v1728_v25, 2 }
 0x123   : > { %v2205_v33 = vpop.eup %2204  ;;  %2214 = vrcp.f32 %v1837_v28  ;;  %v1839_v34 = vadd.f32 1.0, %v2203_v29  ;;  %v1737_v35 = vrot.slane %v1736_v38, 1  ;;  %v1741_v36 = vrot.slane %v1740_v26, 2 }
 0x124   : > { %v2207_v40 = vpop.eup %2206  ;;  %2216 = vrcp.f32 %v1838_v30  ;;  %v1841_v41 = vadd.f32 1.0, %v2205_v33  ;;  %v1726_v42 = vadd.f32 %v1725_v31, %v1724_v22  ;;  %v1730_v43 = vadd.f32 %v1729_v32, %v1728_v25 }
 0x125   : > { %v2209_v46 = vpop.eup %2208  ;;  %2218 = vrcp.f32 %v1839_v34  ;;  %v1840_v48 = vadd.f32 1.0, %v2207_v40  ;;  %v1738_v49 = vadd.f32 %v1737_v35, %v1736_v38  ;;  %v1742_v50 = vadd.f32 %v1741_v36, %v1740_v26 }
 0x126   : > { %2220 = vrcp.f32 %v1841_v41  ;;  %v1842_v15 = vadd.f32 1.0, %v2209_v46  ;;  %v1779_v51 = vadd.f32 %v2517_v52, %v1726_v42  ;;  %v1731_v16 = vrot.slane %v1730_v43, 1 }
 0x127   : > { %2222 = vrcp.f32 %v1840_v48  ;;  %v1781_v53 = vadd.f32 %v2517_v52, %v1738_v49  ;;  %v1743_v54 = vrot.slane %v1742_v50, 1  ;;  %v1747_v55 = vrot.slane %v1746_v45, 2 }
 0x128   : > { %2224 = vrcp.f32 %v1842_v15  ;;  %v2109_v56 = vmul.f32 -1.442695, %v1779_v51  ;;  %v1732_v57 = vadd.f32 %v1731_v16, %v1730_v43  ;;  %v1758_v58 = vadd.f32 %v1757_v20, %v1671_v39 }
 0x129   : > { %v2111_v59 = vmul.f32 -1.442695, %v1781_v53  ;;  %v1744_v23 = vadd.f32 %v1743_v54, %v1742_v50  ;;  %v1748_v60 = vadd.f32 %v1747_v55, %v1746_v45  ;;  %v1670_v24 = vmul.f32 %v2515_v47, %v1648_v8 }
 0x12a   : > { %2226 = vpow2.f32 %v2109_v56  ;;  %v1780_v61 = vadd.f32 %v2517_v52, %v1732_v57  ;;  %v1759_v62 = vrot.slane %v1758_v58, 2  ;;  %v1650_v37 = vmax.f32 %v2577_v0, 0.0 }
 0x12b   : > { %v2211_v63 = vpop.eup %2210  ;;  %2228 = vpow2.f32 %v2111_v59  ;;  %v1782_v1 = vadd.f32 %v2517_v52, %v1744_v23  ;;  %v1749_v2 = vrot.slane %v1748_v60, 1  ;;  %v1751_v3 = vrot.slane %v1670_v24, 4 }
 0x12c   : > { %v2213_v7 = vpop.eup %2212  ;;  %v2110_v39 = vmul.f32 -1.442695, %v1780_v61  ;;  %v1760_v10 = vadd.f32 %v1759_v62, %v1758_v58  ;;  %v1672_v11 = vmul.f32 %v2515_v47, %v1650_v37 }
 0x12d   : > { %v2215_v12 = vpop.eup %2214  ;;  %v1899_v8 = vcombine.low %v2211_v63, %v2213_v7  ;;  %v2112_v19 = vmul.f32 -1.442695, %v1782_v1  ;;  %v1750_v20 = vadd.f32 %v1749_v2, %v1748_v60  ;;  %v1752_v44 = vadd.f32 %v1751_v3, %v1670_v24 }
 0x12e   : > { %v2217_v21 = vpop.eup %2216  ;;  %2230 = vpow2.f32 %v2110_v39  ;;  %v1761_v0 = vrot.slane %v1760_v10, 1  ;;  %v1763_v22 = vrot.slane %v1672_v11, 4 }
 0x12f   : > { %v2219_v25 = vpop.eup %2218  ;;  %v1900_v26 = vcombine.low %v2215_v12, %v2217_v21  ;;  %v1915_v47 = vmul.f32 %v1899_v8, %v2387_v4  ;;  %2232 = vpow2.f32 %v2112_v19  ;;  %v1783_v27 = vadd.f32 %v2517_v52, %v1750_v20 }
 0x130   : > { %v2221_v28 = vpop.eup %2220  ;;  %v1762_v38 = vadd.f32 %v1761_v0, %v1760_v10  ;;  %v1753_v45 = vrot.slane %v1752_v44, 2  ;;  %v1764_v29 = vadd.f32 %v1763_v22, %v1672_v11 }
 0x131   : > { %v2223_v30 = vpop.eup %2222  ;;  %v1916_v31 = vmul.f32 %v1900_v26, %v2389_v5  ;;  %1923 = vst [vmem:[%s2590_s11] sm:$0xff] %v1915_v47  ;;  %v2113_v40 = vmul.f32 -1.442695, %v1783_v27 }
 0x132   : > { %v2225_v32 = vpop.eup %2224  ;;  %v1901_v33 = vcombine.low %v2219_v25, %v2223_v30  ;;  %v1785_v34 = vadd.f32 %v2517_v52, %v1762_v38  ;;  %v1754_v35 = vadd.f32 %v1753_v45, %v1752_v44  ;;  %v1765_v36 = vrot.slane %v1764_v29, 2 }
 0x133   : > { %1924 = vst [vmem:[%s2590_s11 + $0x8] sm:$0xff] %v1916_v31  ;;  %v1902_v4 = vcombine.low %v2221_v28, %v2225_v32  ;;  %2234 = vpow2.f32 %v2113_v40 }
 0x134   : > { %v2227_v41 = vpop.eup %2226  ;;  %v1917_v42 = vmul.f32 %v1901_v33, %v2391_v6  ;;  %v2115_v43 = vmul.f32 -1.442695, %v1785_v34  ;;  %v1755_v46 = vrot.slane %v1754_v35, 1  ;;  %v1766_v48 = vadd.f32 %v1765_v36, %v1764_v29 }
 0x135   : > { %v2229_v49 = vpop.eup %2228  ;;  %v1918_v5 = vmul.f32 %v1902_v4, %v2397_v9  ;;  %v1843_v50 = vadd.f32 1.0, %v2227_v41 }
 0x136   : > { %1925 = vst [vmem:[%s2590_s11 + $0x10] sm:$0xff] %v1917_v42  ;;  %v1845_v15 = vadd.f32 1.0, %v2229_v49  ;;  %v1756_v51 = vadd.f32 %v1755_v46, %v1754_v35  ;;  %v1767_v16 = vrot.slane %v1766_v48, 1  ;;  %2236 = vpow2.f32 %v2115_v43 }
 0x137   : > { %1926 = vst [vmem:[%s2590_s11 + $0x18] sm:$0xff] %v1918_v5  ;;  %2238 = vrcp.f32 %v1843_v50 }
 0x138   : > { %v2231_v53 = vpop.eup %2230  ;;  %v1784_v54 = vadd.f32 %v2517_v52, %v1756_v51  ;;  %v1768_v55 = vadd.f32 %v1767_v16, %v1766_v48  ;;  %2240 = vrcp.f32 %v1845_v15 }
 0x139   : > { %v2233_v56 = vpop.eup %2232  ;;  %v1844_v6 = vadd.f32 1.0, %v2231_v53 }
 0x13a   : > { %v1846_v57 = vadd.f32 1.0, %v2233_v56  ;;  %v2114_v58 = vmul.f32 -1.442695, %v1784_v54  ;;  %v1786_v9 = vadd.f32 %v2517_v52, %v1768_v55 }
 0x13b   : > { %2242 = vrcp.f32 %v1844_v6 }
 0x13c   : > { %2244 = vrcp.f32 %v1846_v57  ;;  %v2116_v59 = vmul.f32 -1.442695, %v1786_v9 }
 0x13d   : > { %2246 = vpow2.f32 %v2114_v58  ;;  %v2235_v23 = vpop.eup %2234 }
 0x13e   : > { %2248 = vpow2.f32 %v2116_v59  ;;  %v1847_v62 = vadd.f32 1.0, %v2235_v23 }
 0x140   : > { %v2237_v60 = vpop.eup %2236  ;;  %2250 = vrcp.f32 %v1847_v62 }
 0x141   : > { %v2239_v24 = vpop.eup %2238  ;;  %v1849_v63 = vadd.f32 1.0, %v2237_v60 }
 0x142   : > { %v2241_v61 = vpop.eup %2240 }
 0x143   : > { %2252 = vrcp.f32 %v1849_v63 }
 0x145   : > { %v2243_v37 = vpop.eup %2242 }
 0x146   : > { %v2245_v1 = vpop.eup %2244  ;;  %v1903_v2 = vcombine.low %v2239_v24, %v2243_v37 }
 0x147   : > { %v2247_v3 = vpop.eup %2246  ;;  %v1904_v7 = vcombine.low %v2241_v61, %v2245_v1 }
 0x148   : > { %v2249_v39 = vpop.eup %2248  ;;  %v1919_v52 = vmul.f32 %v1903_v2, %v2408_v13  ;;  %v1848_v10 = vadd.f32 1.0, %v2247_v3 }
 0x149   : > { %v1920_v11 = vmul.f32 %v1904_v7, %v2410_v14  ;;  %v1850_v12 = vadd.f32 1.0, %v2249_v39 }
 0x14a   : > { %1927 = vst [vmem:[%s2590_s11 + $0x20] sm:$0xff] %v1919_v52  ;;  %2254 = vrcp.f32 %v1848_v10  ;;  %v2251_v8 = vpop.eup %2250 }
 0x14b   : > { %1928 = vst [vmem:[%s2590_s11 + $0x28] sm:$0xff] %v1920_v11  ;;  %2256 = vrcp.f32 %v1850_v12 }
 0x14d   : > { %v2253_v19 = vpop.eup %2252 }
 0x154   : > { %v2255_v20 = vpop.eup %2254 }
 0x155   : > { %v2257_v44 = vpop.eup %2256  ;;  %v1905_v21 = vcombine.low %v2251_v8, %v2255_v20 }
 0x156   : > { %v1906_v0 = vcombine.low %v2253_v19, %v2257_v44 }
 0x157   : > { %v1921_v13 = vmul.f32 %v1905_v21, %v2428_v17 }
 0x158   : > { %v1922_v22 = vmul.f32 %v1906_v0, %v2430_v18 }
 0x159   : > { %1929 = vst [vmem:[%s2590_s11 + $0x30] sm:$0xff] %v1921_v13 }
 0x15a   : > { %1930 = vst [vmem:[%s2590_s11 + $0x38] sm:$0xff] %v1922_v22 }
 0x15b PF: > { %s18_s30 = sadd.s32 1, %s2296_s30   ;;  %s2635_s26 = smov %s2288_s28 }
 0x15c   : > { %p15_p7 = scmp.ge.s32.totalorder %s18_s30, 6   ;;  %s2636_s27 = smov %s2292_s29 }
 0x15d   : > { %s2637_s28 = smov %s2640_s6  ;;  %s2638_s29 = smov %s2644_s8 }
 0x15e   :  { %17 = sbr.rel (!%p15_p7) target bundleno = 3 (0x3), region = 81 }

</bundles_post_ra>
